<compile_context>
chip_gen: v5e
topology: v5e:2x2
jax: 0.10.0
libtpu: 0.0.40
codegen_flags: <defaults>
</compile_context>

<pallas_src>
import functools

import jax
import jax.numpy as jnp
from jax.experimental import pallas as pl
from jax.experimental.pallas import tpu as pltpu


def _concat_dma_kernel(*refs, sizes):
    """Copy each input (HBM) into its lane slab of the output (HBM) via DMA."""
    n = len(sizes)
    in_refs = refs[:n]
    out_ref = refs[n]
    sem = refs[n + 1]

    copies = []
    off = 0
    for i, (r, sz) in enumerate(zip(in_refs, sizes)):
        # Static, lane-tile-aligned destination slab (off and sz are multiples
        # of 128 elements -- enforced by the wrapper).
        cp = pltpu.make_async_copy(r, out_ref.at[:, off:off + sz], sem.at[i])
        cp.start()
        copies.append(cp)
        off += sz
    for cp in copies:
        cp.wait()


def concat(xs, dimension=1, *, xla_bypass_bytes=1 << 20):
    """torch.cat(xs, dim=dimension) for a list of same-rank arrays."""
    xs = list(xs)
    assert len(xs) >= 1
    ndim = xs[0].ndim
    d = dimension % ndim
    shape0 = xs[0].shape
    for x in xs:
        assert x.ndim == ndim
        assert x.shape[:d] == shape0[:d] and x.shape[d + 1:] == shape0[d + 1:]

    # torch.cat promotes mixed dtypes.
    dtype = jnp.result_type(*[x.dtype for x in xs])
    out_shape = shape0[:d] + (sum(int(x.shape[d]) for x in xs),) + shape0[d + 1:]

    xs = [x.astype(dtype) for x in xs]
    # Zero-size inputs along the concat dim contribute nothing (torch allows them).
    xs_nz = [x for x in xs if int(x.shape[d]) > 0]
    if not xs_nz:
        return jnp.zeros(out_shape, dtype)
    if len(xs_nz) == 1:
        return xs_nz[0].reshape(out_shape)

    # Flatten to 2-D: (B, L_i).  Concat along `d` == per-row contiguous slabs.
    lead = 1
    for s in shape0[:d]:
        lead *= int(s)
    trail = 1
    for s in shape0[d + 1:]:
        trail *= int(s)
    B = max(lead, 1)
    sizes = tuple(int(x.shape[d]) * trail for x in xs_nz)
    L_total = sum(sizes)

    itemsize = jnp.dtype(dtype).itemsize
    total_bytes = B * L_total * itemsize
    # Every slab length a multiple of 128 elements => every running offset is
    # a multiple of 128 as well => all destination slices are lane-tile aligned.
    lane_aligned = all(sz % 128 == 0 for sz in sizes)

    if total_bytes < xla_bypass_bytes or not lane_aligned:
        # Small copies: pallas_call fixed cost dominates.  Unaligned slabs:
        # destination slices would not be lane-tile aligned for the HBM DMA.
        # TODO(synk): add a VMEM repack path for non-128-aligned slabs instead
        # of deferring to XLA.
        return jnp.concatenate(xs_nz, axis=d)

    xs2d = [x.reshape(B, sz) for x, sz in zip(xs_nz, sizes)]
    kernel = functools.partial(_concat_dma_kernel, sizes=sizes)

    out2d = pl.pallas_call(
        kernel,
        out_shape=jax.ShapeDtypeStruct((B, L_total), dtype),
        in_specs=[pl.BlockSpec(memory_space=pl.ANY) for _ in xs2d],
        out_specs=pl.BlockSpec(memory_space=pl.ANY),
        scratch_shapes=[pltpu.SemaphoreType.DMA((len(xs2d),))],
    )(*xs2d)

    return out2d.reshape(out_shape)


if __name__ == "__main__":
    key = jax.random.PRNGKey(0)
    k0, k1, k2 = jax.random.split(key, 3)

    # Small shapes consistent with the module (Concat of NCHW feature maps on
    # the channel dim, as used in YOLO-style models).
    x0 = jax.random.normal(k0, (2, 4, 16, 16), dtype=jnp.float32)
    x1 = jax.random.normal(k1, (2, 4, 16, 16), dtype=jnp.float32)
    x2 = jax.random.normal(k2, (2, 4, 16, 16), dtype=jnp.float32)

    # Force the Pallas HBM->HBM DMA path (disable the small-input bypass).
    out = concat([x0, x1, x2], dimension=1, xla_bypass_bytes=0)
    out = jax.block_until_ready(out)
    ref = jnp.concatenate([x0, x1, x2], axis=1)
    assert out.shape == (2, 12, 16, 16)
    assert jnp.array_equal(out, ref), "mismatch vs jnp.concatenate reference"

    # bf16 through the DMA path (sub-32-bit dtypes are just bytes to the DMA).
    b0 = x0.astype(jnp.bfloat16)
    b1 = x1.astype(jnp.bfloat16)
    outb = jax.block_until_ready(concat([b0, b1], dimension=1, xla_bypass_bytes=0))
    assert jnp.array_equal(outb, jnp.concatenate([b0, b1], axis=1))

    # Non-lane-aligned concat dim (dimension=3, slab=16 elems) takes the
    # jnp.concatenate fallback; still exact.
    out3 = jax.block_until_ready(concat([x0, x1], dimension=3))
    assert jnp.array_equal(out3, jnp.concatenate([x0, x1], axis=3))

    # Default call: small-input bypass path (48 KB < 1 MiB threshold).
    out_def = jax.block_until_ready(concat([x0, x1, x2], dimension=1))
    assert jnp.array_equal(out_def, ref)

    print("KERNEL_OK")
</pallas_src>

<mosaic_0001>
module attributes {stable_mosaic.version = 11 : i64} {
  func.func @_concat_dma_kernel(%arg0: memref<2x1024xf32, #tpu.memory_space<any>>, %arg1: memref<2x1024xf32, #tpu.memory_space<any>>, %arg2: memref<2x1024xf32, #tpu.memory_space<any>>, %arg3: memref<2x3072xf32, #tpu.memory_space<any>>, %arg4: memref<3x!tpu.dma_semaphore, #tpu.memory_space<semaphore_mem>>) attributes {dimension_semantics = [], scalar_prefetch = 0 : i64, scratch_operands = 1 : i64, tpu.core_type = #tpu.core_type<tc>} {
    %c0_i32 = arith.constant 0 : i32
    %c0_i32_0 = arith.constant 0 : i32
    %c0_i32_1 = arith.constant 0 : i32
    %0 = tpu.memref_slice %arg3[%c0_i32_0, %c0_i32_1] : memref<2x3072xf32, #tpu.memory_space<any>> -> memref<2x1024xf32, #tpu.memory_space<any>>
    %1 = tpu.memref_slice %arg4[%c0_i32] : memref<3x!tpu.dma_semaphore, #tpu.memory_space<semaphore_mem>> -> memref<1x!tpu.dma_semaphore, #tpu.memory_space<semaphore_mem>>
    %2 = tpu.memref_squeeze %1 : memref<1x!tpu.dma_semaphore, #tpu.memory_space<semaphore_mem>> -> memref<!tpu.dma_semaphore, #tpu.memory_space<semaphore_mem>>
    tpu.enqueue_dma source(%arg0 : memref<2x1024xf32, #tpu.memory_space<any>>) target(%0 : memref<2x1024xf32, #tpu.memory_space<any>>) target_semaphore(%2 : memref<!tpu.dma_semaphore, #tpu.memory_space<semaphore_mem>>)
    %c1_i32 = arith.constant 1 : i32
    %c0_i32_2 = arith.constant 0 : i32
    %c1024_i32 = arith.constant 1024 : i32
    %3 = tpu.memref_slice %arg3[%c0_i32_2, %c1024_i32] : memref<2x3072xf32, #tpu.memory_space<any>> -> memref<2x1024xf32, #tpu.memory_space<any>>
    %4 = tpu.memref_slice %arg4[%c1_i32] : memref<3x!tpu.dma_semaphore, #tpu.memory_space<semaphore_mem>> -> memref<1x!tpu.dma_semaphore, #tpu.memory_space<semaphore_mem>>
    %5 = tpu.memref_squeeze %4 : memref<1x!tpu.dma_semaphore, #tpu.memory_space<semaphore_mem>> -> memref<!tpu.dma_semaphore, #tpu.memory_space<semaphore_mem>>
    tpu.enqueue_dma source(%arg1 : memref<2x1024xf32, #tpu.memory_space<any>>) target(%3 : memref<2x1024xf32, #tpu.memory_space<any>>) target_semaphore(%5 : memref<!tpu.dma_semaphore, #tpu.memory_space<semaphore_mem>>)
    %c2_i32 = arith.constant 2 : i32
    %c0_i32_3 = arith.constant 0 : i32
    %c2048_i32 = arith.constant 2048 : i32
    %6 = tpu.memref_slice %arg3[%c0_i32_3, %c2048_i32] : memref<2x3072xf32, #tpu.memory_space<any>> -> memref<2x1024xf32, #tpu.memory_space<any>>
    %7 = tpu.memref_slice %arg4[%c2_i32] : memref<3x!tpu.dma_semaphore, #tpu.memory_space<semaphore_mem>> -> memref<1x!tpu.dma_semaphore, #tpu.memory_space<semaphore_mem>>
    %8 = tpu.memref_squeeze %7 : memref<1x!tpu.dma_semaphore, #tpu.memory_space<semaphore_mem>> -> memref<!tpu.dma_semaphore, #tpu.memory_space<semaphore_mem>>
    tpu.enqueue_dma source(%arg2 : memref<2x1024xf32, #tpu.memory_space<any>>) target(%6 : memref<2x1024xf32, #tpu.memory_space<any>>) target_semaphore(%8 : memref<!tpu.dma_semaphore, #tpu.memory_space<semaphore_mem>>)
    %c0_i32_4 = arith.constant 0 : i32
    %c0_i32_5 = arith.constant 0 : i32
    %c0_i32_6 = arith.constant 0 : i32
    %9 = tpu.memref_slice %arg3[%c0_i32_5, %c0_i32_6] : memref<2x3072xf32, #tpu.memory_space<any>> -> memref<2x1024xf32, #tpu.memory_space<any>>
    %10 = tpu.memref_slice %arg4[%c0_i32_4] : memref<3x!tpu.dma_semaphore, #tpu.memory_space<semaphore_mem>> -> memref<1x!tpu.dma_semaphore, #tpu.memory_space<semaphore_mem>>
    %11 = tpu.memref_squeeze %10 : memref<1x!tpu.dma_semaphore, #tpu.memory_space<semaphore_mem>> -> memref<!tpu.dma_semaphore, #tpu.memory_space<semaphore_mem>>
    tpu.wait_dma2 semaphore(%11 : memref<!tpu.dma_semaphore, #tpu.memory_space<semaphore_mem>>) src(%arg0 : memref<2x1024xf32, #tpu.memory_space<any>>) dst(%9 : memref<2x1024xf32, #tpu.memory_space<any>>)
    %c1_i32_7 = arith.constant 1 : i32
    %c0_i32_8 = arith.constant 0 : i32
    %c1024_i32_9 = arith.constant 1024 : i32
    %12 = tpu.memref_slice %arg3[%c0_i32_8, %c1024_i32_9] : memref<2x3072xf32, #tpu.memory_space<any>> -> memref<2x1024xf32, #tpu.memory_space<any>>
    %13 = tpu.memref_slice %arg4[%c1_i32_7] : memref<3x!tpu.dma_semaphore, #tpu.memory_space<semaphore_mem>> -> memref<1x!tpu.dma_semaphore, #tpu.memory_space<semaphore_mem>>
    %14 = tpu.memref_squeeze %13 : memref<1x!tpu.dma_semaphore, #tpu.memory_space<semaphore_mem>> -> memref<!tpu.dma_semaphore, #tpu.memory_space<semaphore_mem>>
    tpu.wait_dma2 semaphore(%14 : memref<!tpu.dma_semaphore, #tpu.memory_space<semaphore_mem>>) src(%arg1 : memref<2x1024xf32, #tpu.memory_space<any>>) dst(%12 : memref<2x1024xf32, #tpu.memory_space<any>>)
    %c2_i32_10 = arith.constant 2 : i32
    %c0_i32_11 = arith.constant 0 : i32
    %c2048_i32_12 = arith.constant 2048 : i32
    %15 = tpu.memref_slice %arg3[%c0_i32_11, %c2048_i32_12] : memref<2x3072xf32, #tpu.memory_space<any>> -> memref<2x1024xf32, #tpu.memory_space<any>>
    %16 = tpu.memref_slice %arg4[%c2_i32_10] : memref<3x!tpu.dma_semaphore, #tpu.memory_space<semaphore_mem>> -> memref<1x!tpu.dma_semaphore, #tpu.memory_space<semaphore_mem>>
    %17 = tpu.memref_squeeze %16 : memref<1x!tpu.dma_semaphore, #tpu.memory_space<semaphore_mem>> -> memref<!tpu.dma_semaphore, #tpu.memory_space<semaphore_mem>>
    tpu.wait_dma2 semaphore(%17 : memref<!tpu.dma_semaphore, #tpu.memory_space<semaphore_mem>>) src(%arg2 : memref<2x1024xf32, #tpu.memory_space<any>>) dst(%15 : memref<2x1024xf32, #tpu.memory_space<any>>)
    return
  }
}

</mosaic_0001>

<bundles_post_ra>
// kernel: tpu_custom_call.1
= control target key start
LH: loop header
LB: loop body
LE: loop exit
PB: predicated region body
PF: predicated region fallthrough
CT: control target
= control target key end

     0   :  { %s89_s21 = smov [#allocation2]   ;;  %s90_s22 = smov [#allocation3]   ;;  %s134_s0 = inlined_call_operand.hbm [shape: f32[2,1024], index: 0, kind: input, shape index: {}]   ;;  %s135_s3 = inlined_call_operand.hbm [shape: f32[2,3072], index: 3, kind: output, shape index: {}]   ;;  %s136_s1 = inlined_call_operand.hbm [shape: f32[2,1024], index: 1, kind: input, shape index: {}]   ;;  %s137_s2 = inlined_call_operand.hbm [shape: f32[2,1024], index: 2, kind: input, shape index: {}]  }
   0x1   :  { %s12_s14 = sshll.u32 %s134_s0, 4  ;;  %s14_s17 = sshll.u32 %s135_s3, 4  ;;  %s13_s14 = int_to_ptr.hbm [resolvable:$true] %s12_s14  ;;  %s15_s17 = int_to_ptr.hbm [resolvable:$true] %s14_s17 }
   0x2   :  { %s19_s20 = scalar_lea.hbm %s135_s3, 16  ;;  %s91_s23 = smov 0  }
   0x3   :  { %18 = dma.general %s13_s14, 256, %s15_s17, %s89_s21, %s90_s22, [#allocation4], %s91_s23, 0  }
   0x4   :  { %s25_s26 = sshll.u32 %s136_s1, 4  ;;  %s27_s27 = sshll.u32 %s19_s20, 4  ;;  %s26_s26 = int_to_ptr.hbm [resolvable:$true] %s25_s26  ;;  %s28_s27 = int_to_ptr.hbm [resolvable:$true] %s27_s27 }
   0x5   :  { %s92_s0 = smov [#allocation2 + $0x1]   ;;  %s93_s28 = smov [#allocation5]  }
   0x6   :  { %31 = dma.general %s26_s26, 256, %s28_s27, %s92_s0, %s93_s28, [#allocation6], %s91_s23, 0  }
   0x7   :  { %s32_s4 = scalar_lea.hbm %s135_s3, 32  ;;  %s38_s7 = sshll.u32 %s137_s2, 4  ;;  %s39_s7 = int_to_ptr.hbm [resolvable:$true] %s38_s7 }
   0x8   :  { %s40_s8 = sshll.u32 %s32_s4, 4  ;;  %s94_s9 = smov [#allocation2 + $0x2]   ;;  %s41_s8 = int_to_ptr.hbm [resolvable:$true] %s40_s8 }
   0x9   :  { %s95_s10 = smov [#allocation7]  }
   0xa   :  { %44 = dma.general %s39_s7, 256, %s41_s8, %s94_s9, %s95_s10, [#allocation8], %s91_s23, 0  }
   0xb   :  { %83 = dma.done.wait [#allocation2], 256 }
   0xc   :  { %84 = vsyncadd [#allocation2], 4294967040 }
   0xd   :  { %85 = dma.done.wait [#allocation2 + $0x1], 256 }
   0xe   :  { %86 = vsyncadd [#allocation2 + $0x1], 4294967040 }
   0xf   :  { %87 = dma.done.wait [#allocation2 + $0x2], 256 }
  0x10   :  { %88 = vsyncadd [#allocation2 + $0x2], 4294967040 }
  0x11   :  { %53 = vsyncmov [#allocation2] }
  0x14   :  { %s54_s1 = vpop.sfrf %53 }
  0x15   :  { %p73_p0 = scmp.ne.s32.totalorder %s54_s1, 0 }
  0x17   :  { %58 = shalt.err (%p73_p0)  }
  0x18   :  { %60 = vsyncmov [#allocation2 + $0x1] }
  0x1b   :  { %s61_s3 = vpop.sfrf %60 }
  0x1c   :  { %p74_p1 = scmp.ne.s32.totalorder %s61_s3, 0 }
  0x1e   :  { %65 = shalt.err (%p74_p1)  }
  0x1f   :  { %67 = vsyncmov [#allocation2 + $0x2] }
  0x22   :  { %s68_s2 = vpop.sfrf %67 }
  0x23   :  { %p75_p2 = scmp.ne.s32.totalorder %s68_s2, 0 }
  0x25   :  { %72 = shalt.err (%p75_p2)  }

</bundles_post_ra>
